<compile_context>
chip_gen: v7x
topology: tpu7x:2x2x1
jax: 0.10.0
libtpu: 0.0.40
codegen_flags: <defaults>
</compile_context>

<pallas_src>
import jax
import jax.numpy as jnp
from jax import lax
from jax.experimental import pallas as pl
from jax.experimental.pallas import tpu as pltpu


def _pick_tile(n, max_tile):
    """Largest tile <= max_tile that divides n and is a multiple of 8
    (or n itself if n <= max_tile / no such divisor exists)."""
    if n <= max_tile:
        return n
    t = (max_tile // 8) * 8
    while t >= 8:
        if n % t == 0:
            return t
        t -= 8
    return n


# ----------------------------------------------------------------------------
# Kernel 1: fused embedding
#   out = tok_emb[ids] + pos_emb[:S]  (+ select(mask, mask_emb[1], mask_emb[0]))
# Token gather = one-hot (TS,V) x (V,H) on the MXU (table VMEM-resident).
# Position / mask contributions are pure VPU adds / selects.
# ----------------------------------------------------------------------------
def _embed_kernel_mask(ids_ref, mask_ref, tok_ref, pos_ref, msk_ref, o_ref):
    ids = ids_ref[0]                                  # (TS, 1) int32
    ts = ids.shape[0]
    v = tok_ref.shape[0]
    onehot = (lax.broadcasted_iota(jnp.int32, (ts, v), 1) == ids)
    onehot = onehot.astype(tok_ref.dtype)             # (TS, V)
    x = lax.dot_general(onehot, tok_ref[...],
                        dimension_numbers=(((1,), (0,)), ((), ())),
                        preferred_element_type=jnp.float32)   # (TS, H)
    x = x + pos_ref[...]                              # broadcast-free add
    msk = msk_ref[...]                                # (2, H)
    m = mask_ref[0]                                   # (TS, 1) int32
    x = x + jnp.where(m == 1, msk[1:2, :], msk[0:1, :])
    o_ref[0] = x.astype(o_ref.dtype)


def _embed_kernel_nomask(ids_ref, tok_ref, pos_ref, o_ref):
    ids = ids_ref[0]                                  # (TS, 1) int32
    ts = ids.shape[0]
    v = tok_ref.shape[0]
    onehot = (lax.broadcasted_iota(jnp.int32, (ts, v), 1) == ids)
    onehot = onehot.astype(tok_ref.dtype)
    x = lax.dot_general(onehot, tok_ref[...],
                        dimension_numbers=(((1,), (0,)), ((), ())),
                        preferred_element_type=jnp.float32)
    x = x + pos_ref[...]
    o_ref[0] = x.astype(o_ref.dtype)


def embed_forward(ids, mask, tok_tbl, pos_tbl, msk_tbl):
    B, S = ids.shape
    V, H = tok_tbl.shape
    TS = _pick_tile(S, 256)
    s_blocks = S // TS

    ids3 = ids.reshape(B, S, 1).astype(jnp.int32)
    pos_s = pos_tbl[:S]                               # (S, H) f32

    ids_spec = pl.BlockSpec((1, TS, 1), lambda b, s: (b, s, 0))
    tok_spec = pl.BlockSpec((V, H), lambda b, s: (0, 0))        # VMEM-resident
    pos_spec = pl.BlockSpec((TS, H), lambda b, s: (s, 0))
    out_spec = pl.BlockSpec((1, TS, H), lambda b, s: (b, s, 0))
    cparams = pltpu.CompilerParams(
        dimension_semantics=("parallel", "parallel"),
        vmem_limit_bytes=64 * 1024 * 1024)

    if mask is None:
        y = pl.pallas_call(
            _embed_kernel_nomask,
            out_shape=jax.ShapeDtypeStruct((B, S, H), jnp.float32),
            grid_spec=pltpu.PrefetchScalarGridSpec(
                num_scalar_prefetch=0,
                grid=(B, s_blocks),
                in_specs=[ids_spec, tok_spec, pos_spec],
                out_specs=out_spec),
            compiler_params=cparams,
        )(ids3, tok_tbl, pos_s)
    else:
        mask3 = mask.reshape(B, S, 1).astype(jnp.int32)
        msk_spec = pl.BlockSpec((2, H), lambda b, s: (0, 0))
        y = pl.pallas_call(
            _embed_kernel_mask,
            out_shape=jax.ShapeDtypeStruct((B, S, H), jnp.float32),
            grid_spec=pltpu.PrefetchScalarGridSpec(
                num_scalar_prefetch=0,
                grid=(B, s_blocks),
                in_specs=[ids_spec, ids_spec, tok_spec, pos_spec, msk_spec],
                out_specs=out_spec),
            compiler_params=cparams,
        )(ids3, mask3, tok_tbl, pos_s, msk_tbl)
    return y


# ----------------------------------------------------------------------------
# Kernel 2: all columns x all layers fused.
#   For every row tile the activation is kept live across the whole layer
#   chain of each column; the column result is written straight into its
#   lane slice of the concatenated (N, C*H) output.
# ----------------------------------------------------------------------------
def _columns_kernel(x_ref, w_ref, b_ref, o_ref):
    C = w_ref.shape[0]
    L = w_ref.shape[1]
    H = x_ref.shape[1]
    x = x_ref[...]                                    # (TN, H) f32
    for c in range(C):                                # small static loops
        act = x
        for l in range(L):
            y = jnp.dot(act.astype(w_ref.dtype), w_ref[c, l],
                        preferred_element_type=jnp.float32)
            act = jnp.tanh(y + b_ref[c, l])           # f32 epilogue (v5e-safe)
        o_ref[:, c * H:(c + 1) * H] = act.astype(o_ref.dtype)


def columns_forward(x_flat, all_w, all_b):
    N, H = x_flat.shape
    C, L = all_w.shape[0], all_w.shape[1]
    TN = _pick_tile(N, 512)
    n_blocks = N // TN

    y = pl.pallas_call(
        _columns_kernel,
        out_shape=jax.ShapeDtypeStruct((N, C * H), jnp.float32),
        grid_spec=pltpu.PrefetchScalarGridSpec(
            num_scalar_prefetch=0,
            grid=(n_blocks,),
            in_specs=[
                pl.BlockSpec((TN, H), lambda n: (n, 0)),
                pl.BlockSpec((C, L, H, H), lambda n: (0, 0, 0, 0)),  # resident
                pl.BlockSpec((C, L, 1, H), lambda n: (0, 0, 0, 0)),  # resident
            ],
            out_specs=pl.BlockSpec((TN, C * H), lambda n: (n, 0))),
        compiler_params=pltpu.CompilerParams(
            dimension_semantics=("parallel",),
            vmem_limit_bytes=64 * 1024 * 1024),
    )(x_flat, all_w, all_b)
    return y


# ----------------------------------------------------------------------------
# Model forward: replicates the column/concat logic of Model.forward.
# ----------------------------------------------------------------------------
def model_forward(ids, mask, params, columns):
    B, S = ids.shape
    x = embed_forward(ids, mask, params["tok_emb"], params["pos_emb"],
                      params["mask_emb"])                       # (B, S, H)
    H = x.shape[-1]

    layers = params["layers"]
    C = columns
    # Original uses float division len(layers)/columns; assumed exact here.
    L = len(layers) // C
    all_w = jnp.stack(
        [jnp.stack([layers[c * L + l][0] for l in range(L)]) for c in range(C)]
    ).astype(jnp.bfloat16)                                       # (C, L, H, H)
    all_b = jnp.stack(
        [jnp.stack([layers[c * L + l][1] for l in range(L)]) for c in range(C)]
    ).astype(jnp.float32)                                        # (C, L, 1, H)

    y = columns_forward(x.reshape(B * S, H), all_w, all_b)       # (N, C*H)
    return y.reshape(B, S, C * H)


# ----------------------------------------------------------------------------
# Pure-JAX reference (f32) mirroring the original PyTorch forward exactly.
# ----------------------------------------------------------------------------
def reference_forward(ids, mask, params, columns):
    B, S = ids.shape
    x = params["tok_emb"][ids] + params["pos_emb"][:S][None, :, :]
    if mask is not None:
        x = x + params["mask_emb"][mask]
    layers = params["layers"]
    L = len(layers) // columns
    out = []
    o = None
    for i, (w, b) in enumerate(layers):
        if i % L == 0:
            if i > 0:
                out.append(o)
            o = jnp.tanh(x @ w + b)
        else:
            o = jnp.tanh(o @ w + b)
    out.append(o)
    return jnp.concatenate(out, axis=-1)


# ----------------------------------------------------------------------------
if __name__ == "__main__":
    vocab_size = 128
    hidden_size = 32
    max_position_embeddings = 64
    columns = 2
    num_layers = 4          # 2 layers per column
    batch, seq = 2, 8

    key = jax.random.PRNGKey(0)
    keys = jax.random.split(key, 5 + 2 * num_layers)

    params = {
        "tok_emb": 0.02 * jax.random.normal(
            keys[0], (vocab_size, hidden_size), jnp.float32),
        "pos_emb": 0.02 * jax.random.normal(
            keys[1], (max_position_embeddings, hidden_size), jnp.float32),
        "mask_emb": 0.02 * jax.random.normal(
            keys[2], (2, hidden_size), jnp.float32),
        "layers": [
            (0.1 * jax.random.normal(keys[5 + 2 * i],
                                     (hidden_size, hidden_size), jnp.float32),
             0.1 * jax.random.normal(keys[6 + 2 * i],
                                     (1, hidden_size), jnp.float32))
            for i in range(num_layers)
        ],
    }

    ids = jax.random.randint(keys[3], (batch, seq), 0, vocab_size,
                             dtype=jnp.int32)
    mask = jax.random.randint(keys[4], (batch, seq), 0, 2, dtype=jnp.int32)

    # Path with mask
    y = jax.block_until_ready(model_forward(ids, mask, params, columns))
    y_ref = reference_forward(ids, mask, params, columns)
    expected_shape = (batch, seq, columns * hidden_size)
    assert y.shape == expected_shape, (y.shape, expected_shape)
    assert bool(jnp.all(jnp.isfinite(y)))
    assert float(jnp.max(jnp.abs(y - y_ref))) < 1e-2, "mask path mismatch"

    # Path with mask=None (compiles the 2-input embedding kernel)
    y2 = jax.block_until_ready(model_forward(ids, None, params, columns))
    y2_ref = reference_forward(ids, None, params, columns)
    assert y2.shape == expected_shape
    assert bool(jnp.all(jnp.isfinite(y2)))
    assert float(jnp.max(jnp.abs(y2 - y2_ref))) < 1e-2, "no-mask path mismatch"

    print("KERNEL_OK")
</pallas_src>

<mosaic_0001>
module attributes {stable_mosaic.version = 11 : i64} {
  func.func @_embed_kernel_mask(%arg0: i32, %arg1: i32, %arg2: memref<1x8x1xi32, #tpu.memory_space<vmem>>, %arg3: memref<1x8x1xi32, #tpu.memory_space<vmem>>, %arg4: memref<128x32xf32, #tpu.memory_space<vmem>>, %arg5: memref<8x32xf32, #tpu.memory_space<vmem>>, %arg6: memref<2x32xf32, #tpu.memory_space<vmem>>, %arg7: memref<1x8x32xf32, #tpu.memory_space<vmem>>) attributes {dimension_semantics = [#tpu.dimension_semantics<parallel>, #tpu.dimension_semantics<parallel>], iteration_bounds = array<i64: 2, 1>, scalar_prefetch = 0 : i64, scratch_operands = 0 : i64, tpu.core_type = #tpu.core_type<tc>, window_params = [{transform_indices = @transform_0, window_bounds = array<i64: 1, 8, 1>}, {transform_indices = @transform_1, window_bounds = array<i64: 1, 8, 1>}, {pipeline_mode = #tpu.pipeline_mode<synchronous>, transform_indices = @transform_2, window_bounds = array<i64: 128, 32>}, {transform_indices = @transform_3, window_bounds = array<i64: 8, 32>}, {pipeline_mode = #tpu.pipeline_mode<synchronous>, transform_indices = @transform_4, window_bounds = array<i64: 2, 32>}, {transform_indices = @transform_5, window_bounds = array<i64: 1, 8, 32>}]} {
    %c0 = arith.constant 0 : index
    %c0_0 = arith.constant 0 : index
    %c0_1 = arith.constant 0 : index
    %0 = vector.load %arg2[%c0, %c0_0, %c0_1] : memref<1x8x1xi32, #tpu.memory_space<vmem>>, vector<1x8x1xi32>
    %1 = vector.shape_cast %0 : vector<1x8x1xi32> to vector<8x1xi32>
    %2 = tpu.iota {dimensions = array<i32: 1>} : vector<8x128xi32>
    %3 = vector.broadcast %1 : vector<8x1xi32> to vector<8x128xi32>
    %4 = arith.cmpi eq, %2, %3 : vector<8x128xi32>
    %5 = arith.extui %4 : vector<8x128xi1> to vector<8x128xi32>
    %6 = arith.sitofp %5 : vector<8x128xi32> to vector<8x128xf32>
    %c0_2 = arith.constant 0 : index
    %c0_3 = arith.constant 0 : index
    %7 = vector.load %arg4[%c0_2, %c0_3] : memref<128x32xf32, #tpu.memory_space<vmem>>, vector<128x32xf32>
    %cst = arith.constant dense<0.000000e+00> : vector<8x32xf32>
    %8 = tpu.matmul %6, %7, %cst {dimension_numbers = #tpu.dot_dimension_numbers<[1], [0], [0], [1], [0, 0, 1, 1], [], []>} : vector<8x128xf32>, vector<128x32xf32>, vector<8x32xf32> -> vector<8x32xf32>
    %c0_4 = arith.constant 0 : index
    %c0_5 = arith.constant 0 : index
    %9 = vector.load %arg5[%c0_4, %c0_5] : memref<8x32xf32, #tpu.memory_space<vmem>>, vector<8x32xf32>
    %10 = arith.addf %8, %9 : vector<8x32xf32>
    %c0_6 = arith.constant 0 : index
    %c0_7 = arith.constant 0 : index
    %11 = vector.load %arg6[%c0_6, %c0_7] : memref<2x32xf32, #tpu.memory_space<vmem>>, vector<2x32xf32>
    %c0_8 = arith.constant 0 : index
    %c0_9 = arith.constant 0 : index
    %c0_10 = arith.constant 0 : index
    %12 = vector.load %arg3[%c0_8, %c0_9, %c0_10] : memref<1x8x1xi32, #tpu.memory_space<vmem>>, vector<1x8x1xi32>
    %13 = vector.shape_cast %12 : vector<1x8x1xi32> to vector<8x1xi32>
    %c1_i32 = arith.constant 1 : i32
    %14 = vector.broadcast %c1_i32 : i32 to vector<8x1xi32>
    %15 = arith.cmpi eq, %13, %14 : vector<8x1xi32>
    %16 = vector.extract_strided_slice %11 {offsets = [1, 0], sizes = [1, 32], strides = [1, 1]} : vector<2x32xf32> to vector<1x32xf32>
    %17 = vector.extract_strided_slice %11 {offsets = [0, 0], sizes = [1, 32], strides = [1, 1]} : vector<2x32xf32> to vector<1x32xf32>
    %18 = vector.shape_cast %15 : vector<8x1xi1> to vector<8x1xi1>
    %19 = vector.broadcast %18 : vector<8x1xi1> to vector<8x32xi1>
    %20 = vector.shape_cast %16 : vector<1x32xf32> to vector<1x32xf32>
    %21 = vector.broadcast %20 : vector<1x32xf32> to vector<8x32xf32>
    %22 = vector.shape_cast %17 : vector<1x32xf32> to vector<1x32xf32>
    %23 = vector.broadcast %22 : vector<1x32xf32> to vector<8x32xf32>
    %24 = arith.select %19, %21, %23 : vector<8x32xi1>, vector<8x32xf32>
    %25 = arith.addf %10, %24 : vector<8x32xf32>
    %c0_11 = arith.constant 0 : index
    %c0_12 = arith.constant 0 : index
    %c0_13 = arith.constant 0 : index
    %26 = vector.load %arg7[%c0_11, %c0_12, %c0_13] : memref<1x8x32xf32, #tpu.memory_space<vmem>>, vector<1x8x32xf32>
    %27 = vector.shape_cast %26 : vector<1x8x32xf32> to vector<8x32xf32>
    %28 = vector.shape_cast %25 : vector<8x32xf32> to vector<1x8x32xf32>
    tpu.vector_store %arg7[%c0_11, %c0_12, %c0_13], %28 {strides = array<i32>} : memref<1x8x32xf32, #tpu.memory_space<vmem>>, vector<1x8x32xf32>,
    return
  }
  func.func @transform_0(%arg0: i32, %arg1: i32) -> (i32, i32, i32) {
    %c0_i32 = arith.constant 0 : i32
    %c0_i32_0 = arith.constant 0 : i32
    return %arg0, %arg1, %c0_i32 : i32, i32, i32
  }
  func.func @transform_1(%arg0: i32, %arg1: i32) -> (i32, i32, i32) {
    %c0_i32 = arith.constant 0 : i32
    %c0_i32_0 = arith.constant 0 : i32
    return %arg0, %arg1, %c0_i32 : i32, i32, i32
  }
  func.func @transform_2(%arg0: i32, %arg1: i32) -> (i32, i32) {
    %c0_i32 = arith.constant 0 : i32
    %c0_i32_0 = arith.constant 0 : i32
    %c0_i32_1 = arith.constant 0 : i32
    return %c0_i32, %c0_i32_0 : i32, i32
  }
  func.func @transform_3(%arg0: i32, %arg1: i32) -> (i32, i32) {
    %c0_i32 = arith.constant 0 : i32
    %c0_i32_0 = arith.constant 0 : i32
    return %arg1, %c0_i32 : i32, i32
  }
  func.func @transform_4(%arg0: i32, %arg1: i32) -> (i32, i32) {
    %c0_i32 = arith.constant 0 : i32
    %c0_i32_0 = arith.constant 0 : i32
    %c0_i32_1 = arith.constant 0 : i32
    return %c0_i32, %c0_i32_0 : i32, i32
  }
  func.func @transform_5(%arg0: i32, %arg1: i32) -> (i32, i32, i32) {
    %c0_i32 = arith.constant 0 : i32
    %c0_i32_0 = arith.constant 0 : i32
    return %arg0, %arg1, %c0_i32 : i32, i32, i32
  }
}

</mosaic_0001>

<bundles_post_ra>
// kernel: tpu_custom_call.1
= control target key start
LH: loop header
LB: loop body
LE: loop exit
PB: predicated region body
PF: predicated region fallthrough
CT: control target
= control target key end

     0   :  { %s1409_s0 = inlined_call_operand.hbm [shape: s32[2,8,1], index: 0, kind: input, shape index: {}]   ;;  %s1410_s1 = inlined_call_operand.hbm [shape: s32[2,8,1], index: 1, kind: input, shape index: {}]   ;;  %s1411_s2 = inlined_call_operand.hbm [shape: f32[128,32], index: 2, kind: input, shape index: {}]   ;;  %s1412_s3 = inlined_call_operand.hbm [shape: f32[8,32], index: 3, kind: input, shape index: {}]   ;;  %s1413_s4 = inlined_call_operand.hbm [shape: f32[2,32], index: 4, kind: input, shape index: {}]   ;;  %s1414_s5 = inlined_call_operand.hbm [shape: f32[2,8,32], index: 5, kind: output, shape index: {}]  }
   0x1   :  { %1420 = sst [smem:[#allocation18_spill]] %s1411_s2 }
   0x2   :  { %1421 = sst [smem:[#allocation19_spill]] %s1412_s3 }
   0x3   :  { %1422 = sst [smem:[#allocation20_spill]] %s1413_s4 }
   0x4   :  { %10 = vsyncpa [#allocation3], 0 }
   0x5   :  { %12 = vsyncpa [#allocation3 + $0x1], 0 }
   0x6   :  { %13 = vsyncpa [#allocation6], 0 }
   0x7   :  { %15 = vsyncpa [#allocation6 + $0x1], 0 }
   0x8   :  { %16 = vsyncpa [#allocation9], 0 }
   0x9   :  { %17 = vsyncpa [#allocation4], 0 }
   0xa   :  { %19 = vsyncpa [#allocation4 + $0x1], 0  ;;  %s1097_s18 = smov 0   ;;  %s1099_s19 = smov 0  }
   0xb   :  { %s1101_s20 = smov 0   ;;  %s1103_s21 = smov 0  }
   0xc   :  { %s1105_s22 = smov 0   ;;  %s1107_s23 = smov 0  }
   0xd LB: > { %s1128_s24 = sadd.s32 4294967295, %s1052_s23   ;;  %s609_s25 = sadd.s32 4294967294, %s1052_s23   ;;  %s1052_s23 = sphi %s1107_s23, %s25_s23   ;;  %s1048_s22 = sphi %s1105_s22, %s1449_s22   ;;  %s1044_s21 = sphi %s1103_s21, %s1448_s21   ;;  %s1040_s20 = sphi %s1101_s20, %s1447_s20   ;;  %s1036_s19 = sphi %s1099_s19, %s1446_s19   ;;  %s1032_s18 = sphi %s1097_s18, %s1445_s18  }
   0xe   : > { %p59_p0 = scmp.ne.s32.totalorder %s1036_s19, %s1032_s18  ;;  %p1415_p1 = scmp.eq.s32.totalorder %s1128_s24, 0 }
   0xf   : > { %p187_p3 = scmp.eq.s32.totalorder %s609_s25, 1  ;;  %p610_p5 = scmp.ge.s32.totalorder %s1052_s23, 1 }
  0x10   : > { %p1137_p4 = por %p1415_p1, %p59_p0  ;;  %p194_p7 = scmp.lt.s32.totalorder %s1052_s23, 3 }
  0x11   : > { %p1142_p6 = por %p187_p3, %p59_p0  ;;  %s1054_s29 = smov [#allocation7]  }
  0x12   : > { %s1423_s26 = scalar_select %p1137_p4, 1, 0 }
  0x13   : > { %s1424_s27 = scalar_select %p1142_p6, 1, 0 }
  0x14   : > { %p1147_p8 = pnand %p610_p5, %p194_p7  ;;  %s206_s30 = sshll.u32 %s1054_s29, 4  ;;  %s1151_s30 = int_to_ptr.vmem [resolvable:$true] %s206_s30 }
  0x15   : > { %1425 = sst [smem:[#allocation17_spill]] %s1424_s27  ;;  %s1055_s7 = smov [#allocation8]  }
  0x16   : > { %s1426_s28 = scalar_select %p1147_p8, 1, 0 }
  0x17   : > { %p726_p9 = pneg %p1147_p8  ;;  %s222_s8 = sshll.u32 %s1055_s7, 4  ;;  %s1162_s8 = int_to_ptr.vmem [resolvable:$true] %s222_s8 }
  0x18   : > { %s1056_s9 = smov [#allocation10]   ;;  %s1428_s2 = sld [smem:[#allocation18_spill]] }
  0x19   : > { %p1158_p11 = pnand %p726_p9, %p1415_p1  ;;  %s1164_s10 = sshll.u32 %s1056_s9, 4  ;;  %s234_s10 = int_to_ptr.vmem [resolvable:$true] %s1164_s10 }
  0x1b   : > { %p1174_p13 = pneg %p1158_p11 }
  0x1e   : > { %s814_s13 = scalar_lea.hbm %s1428_s2, 2048 }
  0x1f   : > { %p815_p12 = scmp.ne.s32.totalorder %s1428_s2, %s814_s13  ;;  %p821_p5 = scmp.lt.u32.totalorder %s814_s13, %s1428_s2 }
  0x21   : > { %p817_p0 = pnand %p1174_p13, %p815_p12 }
  0x23   : > { %p818_p3 = pneg %p817_p0 }
  0x25   : > { %p823_p7 = pnand %p821_p5, %p818_p3 }
  0x27   : > { %826 = shalt.err (!%p823_p7)
}
  0x28   : > { %s827_s29 = scalar_lea.vmem %s1151_s30, 2048  ;;  %p835_p2 = scmp.lt.s32.totalorder %s1151_s30, %s1151_s30 }
  0x29   : > { %p828_p9 = scmp.ne.s32.totalorder %s1151_s30, %s827_s29  ;;  %p836_p6 = scmp.lt.s32.totalorder %s827_s29, %s827_s29 }
  0x2b   : > { %p830_p10 = pnand %p828_p9, %p1174_p13  ;;  %p837_p12 = por %p836_p6, %p835_p2 }
  0x2d   : > { %p831_p1 = pneg %p830_p10 }
  0x2f   : > { %p838_p0 = pnand %p837_p12, %p831_p1 }
  0x31   : > { %841 = shalt.err (!%p838_p0)
}
  0x32   : > { %s1057_s7 = smov 128   ;;  %s1058_s9 = smov 8  }
  0x33   : > { %729 = dma.hbm_to_vmem [thread:$0]  (!%p1158_p11), %s1428_s2, 2048, %s1151_s30, [#allocation6], %s1057_s7, %s1057_s7, %s1058_s9  }
  0x34   : > { %s1430_s3 = sld [smem:[#allocation19_spill]] }
  0x3a   : > { %s842_s15 = scalar_lea.hbm %s1430_s3, 128 }
  0x3b   : > { %p843_p2 = scmp.ne.s32.totalorder %s1430_s3, %s842_s15  ;;  %p849_p10 = scmp.lt.u32.totalorder %s842_s15, %s1430_s3 }
  0x3d   : > { %p845_p1 = pnand %p843_p2, %p1174_p13 }
  0x3f   : > { %p846_p6 = pneg %p845_p1 }
  0x41   : > { %p851_p3 = pnand %p849_p10, %p846_p6 }
  0x43   : > { %854 = shalt.err (!%p851_p3)
}
  0x44   : > { %s855_s30 = scalar_lea.vmem %s1162_s8, 128  ;;  %p863_p12 = scmp.lt.s32.totalorder %s1162_s8, %s1162_s8 }
  0x45   : > { %p856_p5 = scmp.ne.s32.totalorder %s1162_s8, %s855_s30  ;;  %p864_p0 = scmp.lt.s32.totalorder %s855_s30, %s855_s30 }
  0x47   : > { %p858_p7 = pnand %p856_p5, %p1174_p13  ;;  %p865_p2 = por %p864_p0, %p863_p12 }
  0x49   : > { %p859_p9 = pneg %p858_p7 }
  0x4b   : > { %p866_p1 = pnand %p865_p2, %p859_p9 }
  0x4d   : > { %869 = shalt.err (!%p866_p1)
}
  0x4e   : > { %732 = dma.hbm_to_vmem [thread:$0]  (!%p1158_p11), %s1430_s3, 128, %s1162_s8, [#allocation9]  }
  0x4f   : > { %s1431_s4 = sld [smem:[#allocation20_spill]] }
  0x55   : > { %s870_s12 = scalar_lea.hbm %s1431_s4, 32 }
  0x56   : > { %p871_p6 = scmp.ne.s32.totalorder %s1431_s4, %s870_s12  ;;  %p877_p5 = scmp.lt.u32.totalorder %s870_s12, %s1431_s4 }
  0x58   : > { %p873_p10 = pnand %p871_p6, %p1174_p13 }
  0x5a   : > { %p874_p3 = pneg %p873_p10 }
  0x5c   : > { %p879_p7 = pnand %p877_p5, %p874_p3 }
  0x5e   : > { %882 = shalt.err (!%p879_p7)
}
  0x5f   : > { %s883_s25 = scalar_lea.vmem %s234_s10, 32  ;;  %p891_p2 = scmp.lt.s32.totalorder %s234_s10, %s234_s10 }
  0x60   : > { %p884_p9 = scmp.ne.s32.totalorder %s234_s10, %s883_s25  ;;  %p892_p1 = scmp.lt.s32.totalorder %s883_s25, %s883_s25 }
  0x62   : > { %p886_p12 = pnand %p884_p9, %p1174_p13  ;;  %p893_p4 = por %p892_p1, %p891_p2 }
  0x64   : > { %p887_p0 = pneg %p886_p12 }
  0x66   : > { %p894_p8 = pnand %p893_p4, %p887_p0 }
  0x68   : > { %897 = shalt.err (!%p894_p8)
}
  0x69   : > { %735 = dma.hbm_to_vmem [thread:$0]  (!%p1158_p11), %s1431_s4, 32, %s234_s10, [#allocation9]  }
  0x6a   : > { %s46_s16 = sadd.s32 1, %s1040_s20  ;;  %s37_s30 = sadd.s32 1, %s1048_s22 }
  0x6b   : > { %p53_p4 = scmp.ne.s32.totalorder %s1040_s20, %s1036_s19  ;;  %p39_p8 = scmp.ge.s32.totalorder %s37_s30, 2 }
  0x6c   : > { %p54_p13 = scmp.eq.s32.totalorder %s1052_s23, 0  ;;  %p1432_p6 = scmp.eq.s32.totalorder %s1128_s24, 1 }
  0x6d   : > { %p750_p3 = scmp.lt.s32.totalorder %s1052_s23, 2  ;;  %s1451_s30 = smov (%p39_p8, %s37_s30), 0 }
  0x6e   : > { %p1244_p10 = por %p1432_p6, %p53_p4  ;;  %p55_p5 = por %p54_p13, %p53_p4 }
  0x6f   : > { %s244_s27 = sand.u32 1, %s1040_s20   ;;  %s41_s7 = ssub.s32 %s1048_s22, %s1451_s30 }
  0x70   : > { %s1433_s6 = scalar_select %p1244_p10, 1, 0 }
  0x71   : > { %p44_p11 = scmp.eq.s32.totalorder %s41_s7, 0  ;;  %s1254_s10 = sshll.u32 %s244_s27, 3 }
  0x72   : > { %s616_s9 = sshll.u32 %s1048_s22, 7  ;;  %s248_s15 = scalar_lea.vmem [#allocation2], %s1254_s10 }
  0x73   : > { %s1258_s11 = scalar_select %p44_p11, %s1040_s20, %s46_s16  }
  0x74   : > { %s1263_s14 = scalar_lea.hbm %s1409_s0, %s616_s9  ;;  %s256_s17 = sshll.u32 %s248_s15, 4  ;;  %s1266_s17 = int_to_ptr.vmem [resolvable:$true] %s256_s17 }
  0x75   : > { %p1270_p7 = pnand %p750_p3, %p55_p5  ;;  %s1277_s16 = scalar_lea.hbm %s1410_s1, %s616_s9 }
  0x76   : > { %s263_s7 = sand.u32 1, %s1052_s23   ;;  %s245_s12 = scalar_lea.sflag [#allocation3], %s244_s27 }
  0x77   : > { %s898_s13 = scalar_lea.hbm %s1263_s14, 128  ;;  %p900_p12 = pneg %p1270_p7 }
  0x78   : > { %p899_p9 = scmp.ne.s32.totalorder %s1263_s14, %s898_s13  ;;  %s903_s3 = scalar_lea.hbm %s1409_s0, 256 }
  0x79   : > { %p904_p1 = scmp.lt.u32.totalorder %s1263_s14, %s1409_s0  ;;  %p905_p4 = scmp.lt.u32.totalorder %s903_s3, %s898_s13 }
  0x7a   : > { %p901_p0 = pnand %p900_p12, %p899_p9  ;;  %p907_p13 = scmp.lt.u32.totalorder %s898_s13, %s1263_s14 }
  0x7b   : > { %p906_p8 = por %p905_p4, %p904_p1 }
  0x7c   : > { %p902_p2 = pneg %p901_p0 }
  0x7d   : > { %p908_p6 = por %p907_p13, %p906_p8 }
  0x7f   : > { %p909_p3 = pnand %p908_p6, %p902_p2 }
  0x81   : > { %912 = shalt.err (!%p909_p3)
}
  0x82   : > { %s913_s27 = scalar_lea.vmem %s1266_s17, 128  ;;  %s1059_s2 = smov [#allocation2]  }
  0x83   : > { %p914_p5 = scmp.ne.s32.totalorder %s1266_s17, %s913_s27  ;;  %s918_s9 = sshll.u32 %s1059_s2, 4  ;;  %s919_s9 = int_to_ptr.vmem [resolvable:$false] %s918_s9 }
  0x84   : > { %s920_s4 = scalar_lea.vmem %s919_s9, 256  ;;  %p921_p0 = scmp.lt.s32.totalorder %s1266_s17, %s919_s9 }
  0x85   : > { %p916_p11 = pnand %p914_p5, %p900_p12  ;;  %p922_p1 = scmp.lt.s32.totalorder %s920_s4, %s913_s27 }
  0x87   : > { %p917_p9 = pneg %p916_p11  ;;  %p923_p4 = por %p922_p1, %p921_p0 }
  0x89   : > { %p924_p8 = pnand %p923_p4, %p917_p9 }
  0x8b   : > { %927 = shalt.err (!%p924_p8)
}
  0x8c   : > { %739 = dma.hbm_to_vmem [thread:$0]  (!%p1270_p7), %s1263_s14, 128, %s1266_s17, %s245_s12  }
  0x8d   : > { %s267_s3 = scalar_lea.vmem [#allocation5], %s1254_s10  ;;  %s264_s13 = scalar_lea.sflag [#allocation6], %s263_s7 }
  0x8e   : > { %s275_s29 = sshll.u32 %s267_s3, 4  ;;  %s928_s15 = scalar_lea.hbm %s1277_s16, 128  ;;  %s276_s29 = int_to_ptr.vmem [resolvable:$true] %s275_s29 }
  0x8f   : > { %p929_p2 = scmp.ne.s32.totalorder %s1277_s16, %s928_s15  ;;  %s933_s2 = scalar_lea.hbm %s1410_s1, 256 }
  0x90   : > { %p934_p3 = scmp.lt.u32.totalorder %s1277_s16, %s1410_s1  ;;  %p935_p5 = scmp.lt.u32.totalorder %s933_s2, %s928_s15 }
  0x91   : > { %p931_p13 = pnand %p929_p2, %p900_p12  ;;  %p937_p9 = scmp.lt.u32.totalorder %s928_s15, %s1277_s16 }
  0x92   : > { %p936_p11 = por %p935_p5, %p934_p3 }
  0x93   : > { %p932_p6 = pneg %p931_p13 }
  0x94   : > { %p938_p0 = por %p937_p9, %p936_p11 }
  0x96   : > { %p939_p1 = pnand %p938_p0, %p932_p6 }
  0x98   : > { %942 = shalt.err (!%p939_p1)
}
  0x99   : > { %s943_s10 = scalar_lea.vmem %s276_s29, 128  ;;  %s1060_s14 = smov [#allocation5]  }
  0x9a   : > { %p944_p4 = scmp.ne.s32.totalorder %s276_s29, %s943_s10  ;;  %s948_s17 = sshll.u32 %s1060_s14, 4  ;;  %s949_s17 = int_to_ptr.vmem [resolvable:$false] %s948_s17 }
  0x9b   : > { %s950_s7 = scalar_lea.vmem %s949_s17, 256  ;;  %p951_p13 = scmp.lt.s32.totalorder %s276_s29, %s949_s17 }
  0x9c   : > { %p946_p8 = pnand %p944_p4, %p900_p12  ;;  %p952_p10 = scmp.lt.s32.totalorder %s950_s7, %s943_s10 }
  0x9e   : > { %p947_p2 = pneg %p946_p8  ;;  %p953_p3 = por %p952_p10, %p951_p13 }
  0xa0   : > { %p954_p5 = pnand %p953_p3, %p947_p2 }
  0xa2   : > { %957 = shalt.err (!%p954_p5)
}
  0xa3   : > { %742 = dma.hbm_to_vmem [thread:$0]  (!%p1270_p7), %s1277_s16, 128, %s276_s29, %s264_s13  }
  0xa4   : > { %p1435_p6 = scmp.ne.s32.totalorder %s1426_s28, 0 }
  0xa5   : > { %s1330_s12 = sand.u32 (!%p1435_p6), 1, %s1036_s19   ;;  %p1436_p10 = scmp.ne.s32.totalorder (!%p1435_p6), %s1423_s26, 0 }
  0xa6   : > { %284 = sbr.rel (%p1435_p6) target bundleno = 544 (0x220), region = 40  ;;  %s1333_s3 = sshll.u32 (!%p1435_p6), %s1330_s12, 3 }
  0xa7   : > { %s287_s15 = scalar_lea.sflag (!%p1435_p6), [#allocation3], %s1330_s12  ;;  %s290_s8 = scalar_lea.vmem (!%p1435_p6), [#allocation2], %s1333_s3 }
  0xad   : > { %1011 = dma.done.wait (%p1436_p10), %s287_s15, 128  }
  0xae   : > { %1013 = vsyncadd (%p1436_p10), %s287_s15, 4294967168  ;;  %s295_s28 = sand.u32 1, %s1128_s24   ;;  %s299_s16 = scalar_lea.vmem [#allocation5], %s1333_s3 }
  0xaf   : > { %s296_s25 = scalar_lea.sflag [#allocation6], %s295_s28 }
  0xb0   : > { %1015 = dma.done.wait (%p1436_p10), %s296_s25, 128  }
  0xb1   : > { %1017 = vsyncadd (%p1436_p10), %s296_s25, 4294967168  ;;  %p1437_p7 = scmp.eq.s32.totalorder %s1128_s24, 0 }
  0xb3   : > { %1019 = dma.done.wait (%p1437_p7), [#allocation6], 2048   ;;  %p1438_p12 = pmov %p1437_p7 }
  0xb4   : > { %p1439_p11 = pmov %p1437_p7 }
  0xb5   : > { %1021 = vsyncadd (%p1438_p12), [#allocation6], 4294965248 }
  0xb6   : > { %1023 = dma.done.wait (%p1439_p11), [#allocation9], 160   ;;  %p1440_p9 = pmov %p1437_p7 }
  0xb7   : > { %v1061_v0 = vmov 0   ;;  %v1062_v1 = vmov 0.0|0.0   ;;  %v440_v2 = vld [vmem:[%s299_s16] sm:$0xff]  ;;  %v343_v3 = vld [vmem:[%s290_s8] sm:$0xff]  ;;  %vm1063_vm1 = vmmov 0   ;;  %v1064_v8 = vmov 0.0  }
  0xb8   : > { %1025 = vsyncadd (%p1440_p9), [#allocation9], 4294967136  ;;  %813 = vset.pattern.permute.xlu0 %v1061_v0  ;;  %684 = vmatprep.subr.bf16.mxu0 %v1062_v1  ;;  %v352_v4 = vld [vmem:[#allocation7] sm:$0xff]  ;;  %vm441_vm0 = vcmp.eq.s32.totalorder %v440_v2, 1  ;;  %v353_v5 = vld [vmem:[#allocation7 + $0x8] sm:$0xff]  ;;  %v344_v30 = vlaneseq  ;;  %v1065_v33 = vmov 1.0  }
  0xb9   : > { %347 = vperm.xlu0 %813, %v343_v3   ;;  %v354_v6 = vld [vmem:[#allocation7 + $0x10] sm:$0xff]  ;;  %v355_v7 = vld [vmem:[#allocation7 + $0x18] sm:$0xff]  ;;  %681 = vmatprep.mubr.msk.f32.mxu0 %vm1063_vm1, %v1064_v8  ;;  %v442_v9 = vsel %vm441_vm0, 1, %v1061_v0  ;;  %v685_v10 = vpack.c.bf16 %v353_v5, %v352_v4  ;;  %v356_v12 = vld [vmem:[#allocation7 + $0x20] sm:$0xff]  ;;  %s629_s24 = sshll.u32 %s1044_s21, 7  ;;  %s342_s26 = scalar_lea.vmem [#allocation11], %s1333_s3 }
  0xba   : > { %v688_v11 = vpack.c.bf16 %v355_v7, %v354_v6  ;;  %v357_v13 = vld [vmem:[#allocation7 + $0x28] sm:$0xff]  ;;  %v358_v15 = vld [vmem:[#allocation7 + $0x30] sm:$0xff]  ;;  %v359_v16 = vld [vmem:[#allocation7 + $0x38] sm:$0xff]  ;;  %v345_v31 = vand.u32 127, %v344_v30  ;;  %v448_v34 = vshrl.u32 %v344_v30, 7  ;;  %s474_s29 = sshll.u32 %s342_s26, 4  ;;  %s1360_s2 = scalar_lea.hbm %s1414_s5, %s629_s24  ;;  %s1362_s29 = int_to_ptr.vmem [resolvable:$true] %s474_s29 }
  0xbb   : > { %686 = vmatpush3.bf16.msra.mxu0 %v685_v10  ;;  %v691_v14 = vpack.c.bf16 %v357_v13, %v356_v12  ;;  %v694_v17 = vpack.c.bf16 %v359_v16, %v358_v15  ;;  %v360_v18 = vld [vmem:[#allocation7 + $0x40] sm:$0xff]  ;;  %v361_v19 = vld [vmem:[#allocation7 + $0x48] sm:$0xff]  ;;  %v362_v21 = vld [vmem:[#allocation7 + $0x50] sm:$0xff]  ;;  %vm457_vm4 = vcmask 261120   ;;  %s460_s9 = scalar_lea.sflag [#allocation4], %s1330_s12  ;;  %s958_s21 = scalar_lea.vmem %s1362_s29, 128 }
  0xbc   : > { %687 = vmatprep.subr.bf16.mxu0 %v1062_v1  ;;  %v697_v20 = vpack.c.bf16 %v361_v19, %v360_v18  ;;  %v363_v22 = vld [vmem:[#allocation7 + $0x58] sm:$0xff]  ;;  %v364_v24 = vld [vmem:[#allocation7 + $0x60] sm:$0xff]  ;;  %v365_v25 = vld [vmem:[#allocation7 + $0x68] sm:$0xff]  ;;  %v449_v35 = vsub.s32 1, %v448_v34  ;;  %v453_v36 = vsub.s32 0, %v448_v34  ;;  %p959_p0 = scmp.ne.s32.totalorder %s1362_s29, %s958_s21  ;;  %p1441_p1 = scmp.ne.s32.totalorder %s1433_s6, 0 }
  0xbd   : > { %444 = vperm.xlu0 %813, %v442_v9   ;;  %v700_v23 = vpack.c.bf16 %v363_v22, %v362_v21  ;;  %v703_v26 = vpack.c.bf16 %v365_v25, %v364_v24  ;;  %v366_v27 = vld [vmem:[#allocation7 + $0x70] sm:$0xff]  ;;  %v367_v28 = vld [vmem:[#allocation7 + $0x78] sm:$0xff]  ;;  %v439_v37 = vld [vmem:[#allocation10] sm:$0x3]  ;;  %s1066_s4 = smov [#allocation11]  }
  0xbe   : > { %v706_v29 = vpack.c.bf16 %v367_v28, %v366_v27  ;;  %v450_v39 = vrot.slane %v439_v37, %v449_v35  ;;  %v454_v40 = vrot.slane %v439_v37, %v453_v36  ;;  %v368_v41 = vld [vmem:[#allocation8] sm:$0xff]  ;;  %p960_p4 = pnand %p959_p0, %p1441_p1  ;;  %s962_s10 = sshll.u32 %s1066_s4, 4  ;;  %s963_s10 = int_to_ptr.vmem [resolvable:$false] %s962_s10 }
  0xbf   : > { %689 = vmatpush3.bf16.msra.mxu0 %v688_v11  ;;  %s964_s14 = scalar_lea.vmem %s963_s10, 256  ;;  %p965_p2 = scmp.lt.s32.totalorder %s1362_s29, %s963_s10 }
  0xc0   : > { %690 = vmatprep.subr.bf16.mxu0 %v1062_v1  ;;  %p961_p8 = pneg %p960_p4  ;;  %p966_p13 = scmp.lt.s32.totalorder %s964_s14, %s958_s21 }
  0xc2   : > { %p967_p3 = por %p966_p13, %p965_p2 }
  0xc3   : > { %692 = vmatpush3.bf16.msra.mxu0 %v691_v14 }
  0xc4   : > { %693 = vmatprep.subr.bf16.mxu0 %v1062_v1  ;;  %p968_p5 = pnand %p967_p3, %p961_p8 }
  0xc7   : > { %695 = vmatpush3.bf16.msra.mxu0 %v694_v17 }
  0xc8   : > { %696 = vmatprep.subr.bf16.mxu0 %v1062_v1 }
  0xcb   : > { %698 = vmatpush3.bf16.msra.mxu0 %v697_v20 }
  0xcc   : > { %699 = vmatprep.subr.bf16.mxu0 %v1062_v1 }
  0xcf   : > { %701 = vmatpush3.bf16.msra.mxu0 %v700_v23 }
  0xd0   : > { %702 = vmatprep.subr.bf16.mxu0 %v1062_v1 }
  0xd3   : > { %704 = vmatpush3.bf16.msra.mxu0 %v703_v26 }
  0xd4   : > { %705 = vmatprep.subr.bf16.mxu0 %v1062_v1 }
  0xd7   : > { %707 = vmatpush3.bf16.msra.mxu0 %v706_v29 }
 0x138   : > { %v348_v32 = vpop.permute.xlu0 %347 }
 0x139   : > { %vm349_vm2 = vcmp.eq.s32.totalorder %v345_v31, %v348_v32 }
 0x13a   : > { %682 = vmatmul.mubr.msk.f32.vlgmr.msra.gmra.mrb[0].mxu0 %vm349_vm2, %v1065_v33 }
 0x13c   : > { %v445_v38 = vpop.permute.xlu0 %444 }
 0x13d   : > { %vm446_vm3 = vcmp.eq.s32.totalorder %v445_v38, 1 }
 0x13e   : > { %v455_v45 = vsel %vm446_vm3, %v450_v39, %v454_v40 }
 0x20d   : > { %v435_v42 = vpop.f32.mrb[0].mxu0 }
 0x20e   : > { %v436_v43 = vadd.f32 %v435_v42, %v368_v41  ;;  %v683_v44 = vpop.f32.mrb[1].mxu0 }
 0x210   : > { %v456_v46 = vadd.f32 %v455_v45, %v436_v43 }
 0x212   : > { %458 = vst.msk [vmem:[%s342_s26] sm:$0xff] %vm457_vm4, %v456_v46 }
 0x213   : > { %971 = shalt.err (!%p968_p5)
}
 0x214   : > { %s972_s17 = scalar_lea.hbm %s1360_s2, 128  ;;  %s976_s3 = scalar_lea.hbm %s1414_s5, 256 }
 0x215   : > { %p973_p6 = scmp.ne.s32.totalorder %s1360_s2, %s972_s17  ;;  %p977_p12 = scmp.lt.u32.totalorder %s1360_s2, %s1414_s5 }
 0x216   : > { %p978_p11 = scmp.lt.u32.totalorder %s976_s3, %s972_s17  ;;  %p980_p0 = scmp.lt.u32.totalorder %s972_s17, %s1360_s2 }
 0x217   : > { %p974_p10 = pnand %p973_p6, %p1441_p1 }
 0x218   : > { %p979_p9 = por %p978_p11, %p977_p12 }
 0x219   : > { %p975_p7 = pneg %p974_p10 }
 0x21a   : > { %p981_p4 = por %p980_p0, %p979_p9 }
 0x21c   : > { %p982_p8 = pnand %p981_p4, %p975_p7 }
 0x21e   : > { %985 = shalt.err (!%p982_p8)
}
 0x21f   : > { %724 = dma.vmem_to_hbm [thread:$0]  (%p1441_p1), %s1362_s29, 128, %s1360_s2, %s460_s9  }
 0x220 PF: > { %s1442_s28 = sld [smem:[#allocation17_spill]]  ;;  %s486_s25 = sand.u32 1, %s1032_s18  }
 0x221   : > { %p1444_p13 = scmp.ge.s32.totalorder %s1052_s23, 2  ;;  %s487_s16 = scalar_lea.sflag [#allocation4], %s486_s25 }
 0x226   : > { %p1443_p2 = scmp.ne.s32.totalorder %s1442_s28, 0 }
 0x228   : > { %p744_p3 = pnand %p1444_p13, %p1443_p2 }
 0x22a   : > { %1027 = dma.done.wait (!%p744_p3), %s487_s16, 128  }
 0x22b   : > { %1029 = vsyncadd (!%p744_p3), %s487_s16, 4294967168  ;;  %s25_s23 = sadd.s32 1, %s1052_s23   ;;  %s1445_s18 = smov %s1036_s19 }
 0x22c   : > { %p22_p5 = scmp.ge.s32.totalorder %s25_s23, 4   ;;  %s1446_s19 = smov %s1040_s20 }
 0x22d   : > { %s1447_s20 = smov %s1258_s11  ;;  %s1448_s21 = smov %s1048_s22 }
 0x22e   : > { %s1449_s22 = smov %s1451_s30  ;;  %24 = sbr.rel (!%p22_p5) target bundleno = 13 (0xd), region = 111 }
 0x235   :  { %492 = vsyncpa [#allocation3], 1 }
 0x236   :  { %494 = vsyncpa [#allocation3 + $0x1], 1 }
 0x237   :  { %495 = vsyncpa [#allocation6], 1 }
 0x238   :  { %497 = vsyncpa [#allocation6 + $0x1], 1 }
 0x239   :  { %498 = vsyncpa [#allocation9], 1 }
 0x23a   :  { %499 = vsyncpa [#allocation4], 1 }
 0x23b   :  { %501 = vsyncpa [#allocation4 + $0x1], 1 }

</bundles_post_ra>
